<compile_context>
chip_gen: v5e
topology: v5e:2x2
jax: 0.10.0
libtpu: 0.0.40
codegen_flags: <defaults>
</compile_context>

<pallas_src>
import jax
import jax.numpy as jnp
from jax.experimental import pallas as pl
from jax.experimental.pallas import tpu as pltpu

_LANE = 128
_MAX_COLS = 1024                          # 8 vregs wide: lane-dense, unmasked stores
_TARGET_BLOCK_BYTES = 4 * 1024 * 1024     # 4 MiB/block -> 24 MiB pipelined (3 specs x 2 bufs)
_VMEM_LIMIT_BYTES = 48 * 1024 * 1024      # <= 64 MiB/TC on v7x; well under 128 MiB on v5e/v6e
_MIN_GRID_STEPS = 4                       # megacore sharding + read/write DMA overlap
_SMALL_BYTES = 1 << 20                    # < 1 MiB per array: skip the kernel entirely


def _rev_add_kernel(x_ref, skip_ref, o_ref):
    # Elementwise hot path: out = x + skip (pure HBM-bandwidth bound).
    o_ref[...] = x_ref[...] + skip_ref[...]


def _sublane(dtype) -> int:
    # Minimum second-minor tile: 8 rows for 4-byte, 16 for 2-byte, 32 for 1-byte dtypes.
    return max(8, 32 // jnp.dtype(dtype).itemsize)


def _round_up(x: int, m: int) -> int:
    return (x + m - 1) // m * m


def rev_add(x: jax.Array, skip: jax.Array, *, force_pallas: bool = False) -> jax.Array:
    """Forward of RevAdd: out = x + skip (the `invert` flag does not change values)."""
    assert x.shape == skip.shape and x.dtype == skip.dtype
    orig_shape = x.shape
    total = int(x.size)
    itemsize = jnp.dtype(x.dtype).itemsize

    # ---- Small-tensor fast path ------------------------------------------------
    if not force_pallas and total * itemsize < _SMALL_BYTES:
        return x + skip

    # ---- Lane-dense flat layout without padding --------------------------------
    # Pick the widest column count (multiple of 128) that divides the flat size,
    # so the reshape is a pure view and no pad copy is ever materialized.
    cols = _MAX_COLS
    while cols > _LANE and total % cols != 0:
        cols //= 2
    if total % cols != 0:
        # TODO(synk): flat size not a multiple of 128 lanes; a Pallas tiling would
        # need a full pad copy (~2x HBM traffic), so let XLA's fused elementwise
        # add handle it (it is already at HBM roofline).
        return x + skip

    rows = total // cols
    x2 = x.reshape(rows, cols)
    s2 = skip.reshape(rows, cols)

    # ---- Block-row selection (dtype-aware, VMEM-budgeted, >= 4 grid steps) ------
    sub = _sublane(x.dtype)
    if rows <= sub:
        block_rows = rows  # single full-extent block (block dim == array dim is legal)
    else:
        max_rows_by_vmem = max(sub, (_TARGET_BLOCK_BYTES // (cols * itemsize)) // sub * sub)
        rows_for_steps = _round_up(pl.cdiv(rows, _MIN_GRID_STEPS), sub)
        block_rows = max(sub, min(max_rows_by_vmem, rows_for_steps))

    # Non-divisible tail handled by Pallas: tail reads are ignored, tail writes masked.
    grid = (pl.cdiv(rows, block_rows),)

    out = pl.pallas_call(
        _rev_add_kernel,
        out_shape=jax.ShapeDtypeStruct((rows, cols), x.dtype),
        grid=grid,
        in_specs=[
            pl.BlockSpec((block_rows, cols), lambda i: (i, 0)),
            pl.BlockSpec((block_rows, cols), lambda i: (i, 0)),
        ],
        out_specs=pl.BlockSpec((block_rows, cols), lambda i: (i, 0)),
        compiler_params=pltpu.CompilerParams(
            dimension_semantics=("parallel",),
            vmem_limit_bytes=_VMEM_LIMIT_BYTES,
        ),
    )(x2, s2)

    return out.reshape(orig_shape)


class RevAddJax:
    """Mirror of the PyTorch RevAdd module (forward/inference semantics)."""

    def __init__(self, invert: bool = True):
        self.set_invert(invert)
        self.skip = None

    def set_invert(self, invert: bool):
        self.invert = invert

    def register_skip(self, skip: jax.Array) -> jax.Array:
        self.skip = skip
        # `skip + 0` in PyTorch only detaches storage; values are identical.
        return skip

    def __call__(self, x: jax.Array) -> jax.Array:
        # TODO(synk): the reversible-training machinery (backward hook that
        # reconstructs x = out - skip and frees x's storage) is an in-place
        # memory optimization with no Pallas equivalent; forward values are exact.
        return rev_add(x, self.skip)


if __name__ == "__main__":
    key = jax.random.PRNGKey(0)
    k1, k2, k3, k4, k5, k6 = jax.random.split(key, 6)

    # Shape implied by the module usage (NCHW feature map). Force the Pallas
    # path so the kernel itself is exercised even at this small size.
    N, C, H, W = 2, 4, 16, 16
    x = jax.random.normal(k1, (N, C, H, W), dtype=jnp.float32)
    skip = jax.random.normal(k2, (N, C, H, W), dtype=jnp.float32)

    mod = RevAddJax(invert=True)
    mod.register_skip(skip)

    out = jax.block_until_ready(rev_add(x, skip, force_pallas=True))
    ref = x + skip
    assert out.shape == (N, C, H, W) and out.dtype == x.dtype
    assert jnp.allclose(out, ref, atol=1e-6, rtol=1e-6)

    # Wrapper (fast path at this size) must agree too.
    out_mod = jax.block_until_ready(mod(x))
    assert jnp.allclose(out_mod, ref, atol=1e-6, rtol=1e-6)

    # Larger f32 case: multi-step grid with a masked, non-divisible tail block.
    xf = jax.random.normal(k3, (3, 200, 32, 32), dtype=jnp.float32)
    sf = jax.random.normal(k4, (3, 200, 32, 32), dtype=jnp.float32)
    of = jax.block_until_ready(rev_add(xf, sf))
    assert jnp.allclose(of, xf + sf, atol=1e-6, rtol=1e-6)

    # bf16 case: exercises the dtype-aware (16-row) sublane alignment.
    xb = jax.random.normal(k5, (600, 1024), dtype=jnp.bfloat16)
    sb = jax.random.normal(k6, (600, 1024), dtype=jnp.bfloat16)
    ob = jax.block_until_ready(rev_add(xb, sb))
    assert jnp.allclose(ob.astype(jnp.float32), (xb + sb).astype(jnp.float32))

    print("KERNEL_OK")
</pallas_src>

<mosaic_0001>
module attributes {stable_mosaic.version = 11 : i64} {
  func.func @_rev_add_kernel(%arg0: i32, %arg1: memref<2x1024xf32, #tpu.memory_space<vmem>>, %arg2: memref<2x1024xf32, #tpu.memory_space<vmem>>, %arg3: memref<2x1024xf32, #tpu.memory_space<vmem>>) attributes {dimension_semantics = [#tpu.dimension_semantics<parallel>], iteration_bounds = array<i64: 1>, scalar_prefetch = 0 : i64, scratch_operands = 0 : i64, tpu.core_type = #tpu.core_type<tc>, window_params = [{transform_indices = @transform_0, window_bounds = array<i64: 2, 1024>}, {transform_indices = @transform_1, window_bounds = array<i64: 2, 1024>}, {transform_indices = @transform_2, window_bounds = array<i64: 2, 1024>}]} {
    %c0 = arith.constant 0 : index
    %c0_0 = arith.constant 0 : index
    %0 = vector.load %arg1[%c0, %c0_0] : memref<2x1024xf32, #tpu.memory_space<vmem>>, vector<2x1024xf32>
    %c0_1 = arith.constant 0 : index
    %c0_2 = arith.constant 0 : index
    %1 = vector.load %arg2[%c0_1, %c0_2] : memref<2x1024xf32, #tpu.memory_space<vmem>>, vector<2x1024xf32>
    %2 = arith.addf %0, %1 : vector<2x1024xf32>
    %c0_3 = arith.constant 0 : index
    %c0_4 = arith.constant 0 : index
    %3 = vector.load %arg3[%c0_3, %c0_4] : memref<2x1024xf32, #tpu.memory_space<vmem>>, vector<2x1024xf32>
    tpu.vector_store %arg3[%c0_3, %c0_4], %2 {strides = array<i32>} : memref<2x1024xf32, #tpu.memory_space<vmem>>, vector<2x1024xf32>,
    return
  }
  func.func @transform_0(%arg0: i32) -> (i32, i32) {
    %c0_i32 = arith.constant 0 : i32
    %c0_i32_0 = arith.constant 0 : i32
    return %arg0, %c0_i32 : i32, i32
  }
  func.func @transform_1(%arg0: i32) -> (i32, i32) {
    %c0_i32 = arith.constant 0 : i32
    %c0_i32_0 = arith.constant 0 : i32
    return %arg0, %c0_i32 : i32, i32
  }
  func.func @transform_2(%arg0: i32) -> (i32, i32) {
    %c0_i32 = arith.constant 0 : i32
    %c0_i32_0 = arith.constant 0 : i32
    return %arg0, %c0_i32 : i32, i32
  }
}

</mosaic_0001>

<bundles_post_ra>
// kernel: tpu_custom_call.1
= control target key start
LH: loop header
LB: loop body
LE: loop exit
PB: predicated region body
PF: predicated region fallthrough
CT: control target
= control target key end

     0   :  { %7 = vsyncpa [#allocation3], 0  ;;  %s174_s0 = inlined_call_operand.hbm [shape: f32[2,1024], index: 0, kind: input, shape index: {}]   ;;  %s175_s1 = inlined_call_operand.hbm [shape: f32[2,1024], index: 1, kind: input, shape index: {}]   ;;  %s176_s2 = inlined_call_operand.hbm [shape: f32[2,1024], index: 2, kind: output, shape index: {}]  }
   0x1   :  { %8 = vsyncpa [#allocation6], 0 }
   0x2   :  { %9 = vsyncpa [#allocation4], 0  ;;  %s15_s11 = sshll.u32 %s174_s0, 4  ;;  %s147_s12 = smov [#allocation2]   ;;  %s16_s11 = int_to_ptr.hbm [resolvable:$true] %s15_s11 }
   0x3   :  { %s17_s13 = sshll.u32 %s147_s12, 4  ;;  %s26_s16 = sshll.u32 %s175_s1, 4  ;;  %s18_s13 = int_to_ptr.vmem [resolvable:$true] %s17_s13  ;;  %s27_s16 = int_to_ptr.hbm [resolvable:$true] %s26_s16 }
   0x4   :  { %20 = dma.hbm_to_vmem [thread:$0]  %s16_s11, 256, %s18_s13, [#allocation3]  }
   0x5   :  { %s148_s17 = smov [#allocation5]  }
   0x6   :  { %s28_s18 = sshll.u32 %s148_s17, 4  ;;  %s29_s18 = int_to_ptr.vmem [resolvable:$true] %s28_s18 }
   0x7   :  { %31 = dma.hbm_to_vmem [thread:$0]  %s27_s16, 256, %s29_s18, [#allocation6]  }
   0x8   :  { %141 = dma.done.wait [#allocation3], 256  }
   0x9   :  { %142 = vsyncadd [#allocation3], 4294967040 }
   0xa   :  { %143 = dma.done.wait [#allocation6], 256  }
   0xb   :  { %144 = vsyncadd [#allocation6], 4294967040  ;;  %s149_s19 = smov [#allocation7]   ;;  %s55_s22 = sshll.u32 %s176_s2, 4  ;;  %v40_v0 = vld [vmem:[#allocation2] sm:$0xff]  ;;  %v42_v1 = vld [vmem:[#allocation5] sm:$0xff]  ;;  %s56_s22 = int_to_ptr.hbm [resolvable:$true] %s55_s22 }
   0xc   :  { %s53_s0 = sshll.u32 %s149_s19, 4  ;;  %v41_v2 = vld [vmem:[#allocation2 + $0x8] sm:$0xff]  ;;  %v44_v3 = vadd.f32 %v42_v1, %v40_v0  ;;  %v43_v4 = vld [vmem:[#allocation5 + $0x8] sm:$0xff]  ;;  %s54_s0 = int_to_ptr.vmem [resolvable:$true] %s53_s0 }
   0xd   :  { %v45_v5 = vadd.f32 %v43_v4, %v41_v2 }
   0xe   :  { %46 = vst [vmem:[#allocation7] sm:$0xff] %v44_v3 }
   0xf   :  { %47 = vst [vmem:[#allocation7 + $0x8] sm:$0xff] %v45_v5 }
  0x10   :  { %58 = dma.vmem_to_hbm [thread:$0]  %s54_s0, 256, %s56_s22, [#allocation4]  }
  0x11   :  { %145 = dma.done.wait [#allocation4], 256  }
  0x12   :  { %146 = vsyncadd [#allocation4], 4294967040 }
  0x13   :  { %63 = vsyncpa [#allocation3], 1 }
  0x14   :  { %64 = vsyncpa [#allocation6], 1 }
  0x15   :  { %65 = vsyncpa [#allocation4], 1 }

</bundles_post_ra>
